<compile_context>
chip_gen: v7x
topology: tpu7x:2x2x1
jax: 0.10.0
libtpu: 0.0.40
codegen_flags: <defaults>
</compile_context>

<pallas_src>
import functools

import jax
import jax.numpy as jnp
from jax.experimental import pallas as pl
from jax.experimental.pallas import tpu as pltpu

# Small, MDN-consistent sizes.
INPUT_SIZE = 16        # latent size
CONDITION_SIZE = 16
HIDDEN_SIZE = 32
OUTPUT_SIZE = 8
NUM_GAUSSIANS = 4
EPS = 1e-6

GO = NUM_GAUSSIANS * OUTPUT_SIZE                 # 32 mu channels
HEAD_OUT = NUM_GAUSSIANS + GO + NUM_GAUSSIANS    # [pi logits | mu | sigma_raw] = 40
OUT_W = HEAD_OUT                                 # fused output slab width


def _round_up(n, m):
    return (n + m - 1) // m * m


def mdn_forward_kernel(x_ref, c_ref, w1x_ref, w1c_ref, b1_ref,
                       w2_ref, b2_ref, wh_ref, bh_ref, out_ref):
    # hidden layer 1: split-concat matmul (x @ W1x + cond @ W1c + b1), ReLU.
    # Inputs arrive f32 and are cast to bf16 here (MXU inputs, f32 accumulate).
    h = (jnp.dot(x_ref[...].astype(jnp.bfloat16), w1x_ref[...],
                 preferred_element_type=jnp.float32)
         + jnp.dot(c_ref[...].astype(jnp.bfloat16), w1c_ref[...],
                   preferred_element_type=jnp.float32)
         + b1_ref[...])
    h = jnp.maximum(h, 0.0)

    # hidden layer 2 + ReLU
    h = jnp.dot(h.astype(jnp.bfloat16), w2_ref[...],
                preferred_element_type=jnp.float32) + b2_ref[...]
    h = jnp.maximum(h, 0.0)

    # fused pi + normal heads: columns = [logits(4) | mu(32) | sigma_raw(4)]
    heads = jnp.dot(h.astype(jnp.bfloat16), wh_ref[...],
                    preferred_element_type=jnp.float32) + bh_ref[...]
    logits = heads[:, :NUM_GAUSSIANS]
    mu = heads[:, NUM_GAUSSIANS:NUM_GAUSSIANS + GO]
    sigma_raw = heads[:, NUM_GAUSSIANS + GO:]

    # log_softmax over the 4 mixture logits (f32, EUP exp/log)
    m = jnp.max(logits, axis=1, keepdims=True)
    z = logits - m
    lse = jnp.log(jnp.sum(jnp.exp(z), axis=1, keepdims=True))
    log_pi = z - lse

    # ISOTROPIC: one sigma per gaussian; tiling/reshape happens in the wrapper.
    sigma = jnp.exp(sigma_raw + EPS)

    # single lane-contiguous output slab [TB, 40], one writeback DMA per step
    out_ref[...] = jnp.concatenate([log_pi, mu, sigma], axis=1)


@functools.partial(jax.jit, static_argnames=("block_b",))
def mdn_forward(x, condition, params, block_b=2048):
    """Returns (log_pi [B,G], mu [B,G,O], sigma [B,G,O]) like the torch module."""
    B = x.shape[0]
    TB = min(block_b, _round_up(B, 8))       # batch tile (multiple of 8)
    Bp = _round_up(B, TB)

    xb = x.astype(jnp.float32)
    cb = condition.astype(jnp.float32)
    if Bp != B:
        pad = ((0, Bp - B), (0, 0))
        xb = jnp.pad(xb, pad)
        cb = jnp.pad(cb, pad)

    grid = (Bp // TB,)

    def row_spec(f):
        return pl.BlockSpec((TB, f), lambda i: (i, 0))

    def resident(r, c):
        # weights/biases: same block every step -> stay VMEM-resident
        return pl.BlockSpec((r, c), lambda i: (0, 0))

    out = pl.pallas_call(
        mdn_forward_kernel,
        out_shape=jax.ShapeDtypeStruct((Bp, OUT_W), jnp.float32),
        grid=grid,
        in_specs=[
            row_spec(INPUT_SIZE),
            row_spec(CONDITION_SIZE),
            resident(INPUT_SIZE, HIDDEN_SIZE),
            resident(CONDITION_SIZE, HIDDEN_SIZE),
            resident(1, HIDDEN_SIZE),
            resident(HIDDEN_SIZE, HIDDEN_SIZE),
            resident(1, HIDDEN_SIZE),
            resident(HIDDEN_SIZE, HEAD_OUT),
            resident(1, HEAD_OUT),
        ],
        out_specs=pl.BlockSpec((TB, OUT_W), lambda i: (i, 0)),
        compiler_params=pltpu.CompilerParams(
            dimension_semantics=("parallel",),        # megacore sharding on v7x
            vmem_limit_bytes=64 * 1024 * 1024,
        ),
    )(xb, cb,
      params["w1x"], params["w1c"], params["b1"],
      params["w2"], params["b2"],
      params["wh"], params["bh"])

    out = out[:B]
    log_pi = out[:, :NUM_GAUSSIANS]
    mu = out[:, NUM_GAUSSIANS:NUM_GAUSSIANS + GO].reshape(
        B, NUM_GAUSSIANS, OUTPUT_SIZE)
    sigma_g = out[:, NUM_GAUSSIANS + GO:]
    # torch: sigma.repeat(1, output_size).view(-1, G, O)  (kept bug-for-bug faithful)
    sigma = jnp.tile(sigma_g, (1, OUTPUT_SIZE)).reshape(
        B, NUM_GAUSSIANS, OUTPUT_SIZE)
    return log_pi, mu, sigma


def mdn_forward_ref(x, condition, params):
    """Pure-JAX reference with the same bf16/f32 mixed precision as the kernel."""
    xb = x.astype(jnp.bfloat16)
    cb = condition.astype(jnp.bfloat16)
    h = (jnp.dot(xb, params["w1x"], preferred_element_type=jnp.float32)
         + jnp.dot(cb, params["w1c"], preferred_element_type=jnp.float32)
         + params["b1"])
    h = jnp.maximum(h, 0.0)
    h = jnp.dot(h.astype(jnp.bfloat16), params["w2"],
                preferred_element_type=jnp.float32) + params["b2"]
    h = jnp.maximum(h, 0.0)
    heads = jnp.dot(h.astype(jnp.bfloat16), params["wh"],
                    preferred_element_type=jnp.float32) + params["bh"]
    logits = heads[:, :NUM_GAUSSIANS]
    log_pi = jax.nn.log_softmax(logits, axis=1)
    mu = heads[:, NUM_GAUSSIANS:NUM_GAUSSIANS + GO]
    sigma_g = jnp.exp(heads[:, NUM_GAUSSIANS + GO:] + EPS)
    B = x.shape[0]
    mu = mu.reshape(B, NUM_GAUSSIANS, OUTPUT_SIZE)
    sigma = jnp.tile(sigma_g, (1, OUTPUT_SIZE)).reshape(
        B, NUM_GAUSSIANS, OUTPUT_SIZE)
    return log_pi, mu, sigma


def init_params(key):
    """Deterministic init matching nn.Linear shapes.

    Weights are pre-transposed to [in, out]; w1 is split into x/condition halves
    and the pi/normal heads are fused column-wise into one [HIDDEN, 40] weight.
    Weights are stored in bf16 (MXU inputs), biases in f32.
    """
    ks = jax.random.split(key, 8)
    in_dim = INPUT_SIZE + CONDITION_SIZE

    def lin(kw, kb, fan_in, fan_out):
        bound = 1.0 / float(fan_in) ** 0.5
        w = jax.random.uniform(kw, (fan_in, fan_out), jnp.float32, -bound, bound)
        b = jax.random.uniform(kb, (1, fan_out), jnp.float32, -bound, bound)
        return w, b

    w1, b1 = lin(ks[0], ks[1], in_dim, HIDDEN_SIZE)
    w2, b2 = lin(ks[2], ks[3], HIDDEN_SIZE, HIDDEN_SIZE)
    wpi, bpi = lin(ks[4], ks[5], HIDDEN_SIZE, NUM_GAUSSIANS)
    # ISOTROPIC: num_sigma_channels == num_gaussians
    n_out = OUTPUT_SIZE * NUM_GAUSSIANS + NUM_GAUSSIANS
    wn, bn = lin(ks[6], ks[7], HIDDEN_SIZE, n_out)

    wh = jnp.concatenate([wpi, wn], axis=1)   # [HIDDEN, 4 + 36] = [32, 40]
    bh = jnp.concatenate([bpi, bn], axis=1)   # [1, 40]

    return dict(
        w1x=w1[:INPUT_SIZE].astype(jnp.bfloat16),
        w1c=w1[INPUT_SIZE:].astype(jnp.bfloat16),
        b1=b1,
        w2=w2.astype(jnp.bfloat16),
        b2=b2,
        wh=wh.astype(jnp.bfloat16),
        bh=bh,
    )


if __name__ == "__main__":
    key = jax.random.PRNGKey(0)
    k_x, k_c, k_p = jax.random.split(key, 3)

    B = 8
    x = jax.random.normal(k_x, (B, INPUT_SIZE), jnp.float32)
    condition = jax.random.normal(k_c, (B, CONDITION_SIZE), jnp.float32)
    params = init_params(k_p)

    log_pi, mu, sigma = mdn_forward(x, condition, params)
    jax.block_until_ready((log_pi, mu, sigma))

    assert log_pi.shape == (B, NUM_GAUSSIANS)
    assert mu.shape == (B, NUM_GAUSSIANS, OUTPUT_SIZE)
    assert sigma.shape == (B, NUM_GAUSSIANS, OUTPUT_SIZE)

    # correctness vs pure-JAX reference (same mixed precision)
    r_log_pi, r_mu, r_sigma = mdn_forward_ref(x, condition, params)
    assert jnp.allclose(log_pi, r_log_pi, rtol=1e-2, atol=1e-2)
    assert jnp.allclose(mu, r_mu, rtol=1e-2, atol=1e-2)
    assert jnp.allclose(sigma, r_sigma, rtol=1e-2, atol=1e-2)
    assert bool(jnp.all(jnp.isfinite(log_pi)))

    # non-tile-aligned batch exercises the padding path
    B2 = 12
    x2 = jax.random.normal(k_x, (B2, INPUT_SIZE), jnp.float32)
    c2 = jax.random.normal(k_c, (B2, CONDITION_SIZE), jnp.float32)
    lp2, mu2, sg2 = mdn_forward(x2, c2, params)
    jax.block_until_ready((lp2, mu2, sg2))
    r_lp2, r_mu2, r_sg2 = mdn_forward_ref(x2, c2, params)
    assert jnp.allclose(lp2, r_lp2, rtol=1e-2, atol=1e-2)
    assert jnp.allclose(mu2, r_mu2, rtol=1e-2, atol=1e-2)
    assert jnp.allclose(sg2, r_sg2, rtol=1e-2, atol=1e-2)

    print("KERNEL_OK")
</pallas_src>

<mosaic_0001>
module attributes {stable_mosaic.version = 11 : i64} {
  func.func @mdn_forward_kernel(%arg0: i32, %arg1: memref<8x16xf32, #tpu.memory_space<vmem>>, %arg2: memref<8x16xf32, #tpu.memory_space<vmem>>, %arg3: memref<16x32xbf16, #tpu.memory_space<vmem>>, %arg4: memref<16x32xbf16, #tpu.memory_space<vmem>>, %arg5: memref<1x32xf32, #tpu.memory_space<vmem>>, %arg6: memref<32x32xbf16, #tpu.memory_space<vmem>>, %arg7: memref<1x32xf32, #tpu.memory_space<vmem>>, %arg8: memref<32x40xbf16, #tpu.memory_space<vmem>>, %arg9: memref<1x40xf32, #tpu.memory_space<vmem>>, %arg10: memref<8x40xf32, #tpu.memory_space<vmem>>) attributes {dimension_semantics = [#tpu.dimension_semantics<parallel>], iteration_bounds = array<i64: 1>, scalar_prefetch = 0 : i64, scratch_operands = 0 : i64, tpu.core_type = #tpu.core_type<tc>, window_params = [{transform_indices = @transform_0, window_bounds = array<i64: 8, 16>}, {transform_indices = @transform_1, window_bounds = array<i64: 8, 16>}, {pipeline_mode = #tpu.pipeline_mode<synchronous>, transform_indices = @transform_2, window_bounds = array<i64: 16, 32>}, {pipeline_mode = #tpu.pipeline_mode<synchronous>, transform_indices = @transform_3, window_bounds = array<i64: 16, 32>}, {pipeline_mode = #tpu.pipeline_mode<synchronous>, transform_indices = @transform_4, window_bounds = array<i64: 1, 32>}, {pipeline_mode = #tpu.pipeline_mode<synchronous>, transform_indices = @transform_5, window_bounds = array<i64: 32, 32>}, {pipeline_mode = #tpu.pipeline_mode<synchronous>, transform_indices = @transform_6, window_bounds = array<i64: 1, 32>}, {pipeline_mode = #tpu.pipeline_mode<synchronous>, transform_indices = @transform_7, window_bounds = array<i64: 32, 40>}, {pipeline_mode = #tpu.pipeline_mode<synchronous>, transform_indices = @transform_8, window_bounds = array<i64: 1, 40>}, {transform_indices = @transform_9, window_bounds = array<i64: 8, 40>}]} {
    %c0 = arith.constant 0 : index
    %c0_0 = arith.constant 0 : index
    %0 = vector.load %arg1[%c0, %c0_0] : memref<8x16xf32, #tpu.memory_space<vmem>>, vector<8x16xf32>
    %1 = arith.truncf %0 : vector<8x16xf32> to vector<8x16xbf16>
    %c0_1 = arith.constant 0 : index
    %c0_2 = arith.constant 0 : index
    %2 = vector.load %arg3[%c0_1, %c0_2] : memref<16x32xbf16, #tpu.memory_space<vmem>>, vector<16x32xbf16>
    %cst = arith.constant dense<0.000000e+00> : vector<8x32xf32>
    %3 = tpu.matmul %1, %2, %cst {dimension_numbers = #tpu.dot_dimension_numbers<[1], [0], [0], [1], [0, 0, 1, 1], [], []>} : vector<8x16xbf16>, vector<16x32xbf16>, vector<8x32xf32> -> vector<8x32xf32>
    %c0_3 = arith.constant 0 : index
    %c0_4 = arith.constant 0 : index
    %4 = vector.load %arg2[%c0_3, %c0_4] : memref<8x16xf32, #tpu.memory_space<vmem>>, vector<8x16xf32>
    %5 = arith.truncf %4 : vector<8x16xf32> to vector<8x16xbf16>
    %c0_5 = arith.constant 0 : index
    %c0_6 = arith.constant 0 : index
    %6 = vector.load %arg4[%c0_5, %c0_6] : memref<16x32xbf16, #tpu.memory_space<vmem>>, vector<16x32xbf16>
    %cst_7 = arith.constant dense<0.000000e+00> : vector<8x32xf32>
    %7 = tpu.matmul %5, %6, %cst_7 {dimension_numbers = #tpu.dot_dimension_numbers<[1], [0], [0], [1], [0, 0, 1, 1], [], []>} : vector<8x16xbf16>, vector<16x32xbf16>, vector<8x32xf32> -> vector<8x32xf32>
    %8 = arith.addf %3, %7 : vector<8x32xf32>
    %c0_8 = arith.constant 0 : index
    %c0_9 = arith.constant 0 : index
    %9 = vector.load %arg5[%c0_8, %c0_9] : memref<1x32xf32, #tpu.memory_space<vmem>>, vector<1x32xf32>
    %10 = vector.broadcast %9 : vector<1x32xf32> to vector<8x32xf32>
    %11 = arith.addf %8, %10 : vector<8x32xf32>
    %cst_10 = arith.constant 0.000000e+00 : f32
    %12 = vector.broadcast %cst_10 : f32 to vector<8x32xf32>
    %13 = arith.maximumf %11, %12 : vector<8x32xf32>
    %14 = arith.truncf %13 : vector<8x32xf32> to vector<8x32xbf16>
    %c0_11 = arith.constant 0 : index
    %c0_12 = arith.constant 0 : index
    %15 = vector.load %arg6[%c0_11, %c0_12] : memref<32x32xbf16, #tpu.memory_space<vmem>>, vector<32x32xbf16>
    %cst_13 = arith.constant dense<0.000000e+00> : vector<8x32xf32>
    %16 = tpu.matmul %14, %15, %cst_13 {dimension_numbers = #tpu.dot_dimension_numbers<[1], [0], [0], [1], [0, 0, 1, 1], [], []>} : vector<8x32xbf16>, vector<32x32xbf16>, vector<8x32xf32> -> vector<8x32xf32>
    %c0_14 = arith.constant 0 : index
    %c0_15 = arith.constant 0 : index
    %17 = vector.load %arg7[%c0_14, %c0_15] : memref<1x32xf32, #tpu.memory_space<vmem>>, vector<1x32xf32>
    %18 = vector.broadcast %17 : vector<1x32xf32> to vector<8x32xf32>
    %19 = arith.addf %16, %18 : vector<8x32xf32>
    %cst_16 = arith.constant 0.000000e+00 : f32
    %20 = vector.broadcast %cst_16 : f32 to vector<8x32xf32>
    %21 = arith.maximumf %19, %20 : vector<8x32xf32>
    %22 = arith.truncf %21 : vector<8x32xf32> to vector<8x32xbf16>
    %c0_17 = arith.constant 0 : index
    %c0_18 = arith.constant 0 : index
    %23 = vector.load %arg8[%c0_17, %c0_18] : memref<32x40xbf16, #tpu.memory_space<vmem>>, vector<32x40xbf16>
    %cst_19 = arith.constant dense<0.000000e+00> : vector<8x40xf32>
    %24 = tpu.matmul %22, %23, %cst_19 {dimension_numbers = #tpu.dot_dimension_numbers<[1], [0], [0], [1], [0, 0, 1, 1], [], []>} : vector<8x32xbf16>, vector<32x40xbf16>, vector<8x40xf32> -> vector<8x40xf32>
    %c0_20 = arith.constant 0 : index
    %c0_21 = arith.constant 0 : index
    %25 = vector.load %arg9[%c0_20, %c0_21] : memref<1x40xf32, #tpu.memory_space<vmem>>, vector<1x40xf32>
    %26 = vector.broadcast %25 : vector<1x40xf32> to vector<8x40xf32>
    %27 = arith.addf %24, %26 : vector<8x40xf32>
    %28 = vector.extract_strided_slice %27 {offsets = [0, 0], sizes = [8, 4], strides = [1, 1]} : vector<8x40xf32> to vector<8x4xf32>
    %29 = vector.extract_strided_slice %27 {offsets = [0, 4], sizes = [8, 32], strides = [1, 1]} : vector<8x40xf32> to vector<8x32xf32>
    %30 = vector.extract_strided_slice %27 {offsets = [0, 36], sizes = [8, 4], strides = [1, 1]} : vector<8x40xf32> to vector<8x4xf32>
    %cst_22 = arith.constant dense<0xFF800000> : vector<8xf32>
    %31 = vector.multi_reduction <maximumf>, %28, %cst_22 [1] : vector<8x4xf32> to vector<8xf32>
    %32 = vector.shape_cast %31 : vector<8xf32> to vector<8x1xf32>
    %33 = vector.broadcast %32 : vector<8x1xf32> to vector<8x4xf32>
    %34 = arith.subf %28, %33 : vector<8x4xf32>
    %35 = math.exp %34 : vector<8x4xf32>
    %cst_23 = arith.constant dense<0.000000e+00> : vector<8xf32>
    %36 = vector.multi_reduction <add>, %35, %cst_23 [1] : vector<8x4xf32> to vector<8xf32>
    %37 = vector.shape_cast %36 : vector<8xf32> to vector<8x1xf32>
    %38 = math.log %37 : vector<8x1xf32>
    %39 = vector.broadcast %38 : vector<8x1xf32> to vector<8x4xf32>
    %40 = arith.subf %34, %39 : vector<8x4xf32>
    %cst_24 = arith.constant 9.99999997E-7 : f32
    %41 = vector.broadcast %cst_24 : f32 to vector<8x4xf32>
    %42 = arith.addf %30, %41 : vector<8x4xf32>
    %43 = math.exp %42 : vector<8x4xf32>
    %44 = tpu.concatenate %40, %29, %43 in 1 : vector<8x4xf32>, vector<8x32xf32>, vector<8x4xf32> -> vector<8x40xf32>
    %c0_25 = arith.constant 0 : index
    %c0_26 = arith.constant 0 : index
    %45 = vector.load %arg10[%c0_25, %c0_26] : memref<8x40xf32, #tpu.memory_space<vmem>>, vector<8x40xf32>
    tpu.vector_store %arg10[%c0_25, %c0_26], %44 {strides = array<i32>} : memref<8x40xf32, #tpu.memory_space<vmem>>, vector<8x40xf32>,
    return
  }
  func.func @transform_0(%arg0: i32) -> (i32, i32) {
    %c0_i32 = arith.constant 0 : i32
    %c0_i32_0 = arith.constant 0 : i32
    return %arg0, %c0_i32 : i32, i32
  }
  func.func @transform_1(%arg0: i32) -> (i32, i32) {
    %c0_i32 = arith.constant 0 : i32
    %c0_i32_0 = arith.constant 0 : i32
    return %arg0, %c0_i32 : i32, i32
  }
  func.func @transform_2(%arg0: i32) -> (i32, i32) {
    %c0_i32 = arith.constant 0 : i32
    %c0_i32_0 = arith.constant 0 : i32
    %c0_i32_1 = arith.constant 0 : i32
    return %c0_i32, %c0_i32_0 : i32, i32
  }
  func.func @transform_3(%arg0: i32) -> (i32, i32) {
    %c0_i32 = arith.constant 0 : i32
    %c0_i32_0 = arith.constant 0 : i32
    %c0_i32_1 = arith.constant 0 : i32
    return %c0_i32, %c0_i32_0 : i32, i32
  }
  func.func @transform_4(%arg0: i32) -> (i32, i32) {
    %c0_i32 = arith.constant 0 : i32
    %c0_i32_0 = arith.constant 0 : i32
    %c0_i32_1 = arith.constant 0 : i32
    return %c0_i32, %c0_i32_0 : i32, i32
  }
  func.func @transform_5(%arg0: i32) -> (i32, i32) {
    %c0_i32 = arith.constant 0 : i32
    %c0_i32_0 = arith.constant 0 : i32
    %c0_i32_1 = arith.constant 0 : i32
    return %c0_i32, %c0_i32_0 : i32, i32
  }
  func.func @transform_6(%arg0: i32) -> (i32, i32) {
    %c0_i32 = arith.constant 0 : i32
    %c0_i32_0 = arith.constant 0 : i32
    %c0_i32_1 = arith.constant 0 : i32
    return %c0_i32, %c0_i32_0 : i32, i32
  }
  func.func @transform_7(%arg0: i32) -> (i32, i32) {
    %c0_i32 = arith.constant 0 : i32
    %c0_i32_0 = arith.constant 0 : i32
    %c0_i32_1 = arith.constant 0 : i32
    return %c0_i32, %c0_i32_0 : i32, i32
  }
  func.func @transform_8(%arg0: i32) -> (i32, i32) {
    %c0_i32 = arith.constant 0 : i32
    %c0_i32_0 = arith.constant 0 : i32
    %c0_i32_1 = arith.constant 0 : i32
    return %c0_i32, %c0_i32_0 : i32, i32
  }
  func.func @transform_9(%arg0: i32) -> (i32, i32) {
    %c0_i32 = arith.constant 0 : i32
    %c0_i32_0 = arith.constant 0 : i32
    return %arg0, %c0_i32 : i32, i32
  }
}

</mosaic_0001>

<bundles_post_ra>
// kernel: mdn_forward.1
= control target key start
LH: loop header
LB: loop body
LE: loop exit
PB: predicated region body
PF: predicated region fallthrough
CT: control target
= control target key end

     0   :  { %14 = vsyncpa [#allocation3], 0  ;;  %s950_s0 = inlined_call_operand.hbm [shape: f32[8,16], index: 0, kind: input, shape index: {}]   ;;  %s951_s1 = inlined_call_operand.hbm [shape: f32[8,16], index: 1, kind: input, shape index: {}]   ;;  %s952_s2 = inlined_call_operand.hbm [shape: bf16[16,32], index: 2, kind: input, shape index: {}]   ;;  %s953_s3 = inlined_call_operand.hbm [shape: bf16[16,32], index: 3, kind: input, shape index: {}]   ;;  %s954_s4 = inlined_call_operand.hbm [shape: f32[1,32], index: 4, kind: input, shape index: {}]   ;;  %s955_s5 = inlined_call_operand.hbm [shape: bf16[32,32], index: 5, kind: input, shape index: {}]   ;;  %s956_s6 = inlined_call_operand.hbm [shape: f32[1,32], index: 6, kind: input, shape index: {}]   ;;  %s957_s7 = inlined_call_operand.hbm [shape: bf16[32,40], index: 7, kind: input, shape index: {}]   ;;  %s958_s8 = inlined_call_operand.hbm [shape: f32[1,40], index: 8, kind: input, shape index: {}]   ;;  %s959_s9 = inlined_call_operand.hbm [shape: f32[8,40], index: 9, kind: output, shape index: {}]  }
   0x1   :  { %15 = vsyncpa [#allocation6], 0 }
   0x2   :  { %16 = vsyncpa [#allocation9], 0 }
   0x3   :  { %17 = vsyncpa [#allocation12], 0 }
   0x4   :  { %18 = vsyncpa [#allocation15], 0 }
   0x5   :  { %19 = vsyncpa [#allocation4], 0  ;;  %s747_s30 = smov [#allocation5]   ;;  %s515_s13 = scalar_lea.hbm %s951_s1, 128 }
   0x6   :  { %s36_s10 = sshll.u32 %s747_s30, 4  ;;  %p516_p0 = scmp.ne.s32.totalorder %s951_s1, %s515_s13  ;;  %s37_s10 = int_to_ptr.vmem [resolvable:$true] %s36_s10 }
   0x7   :  { %p519_p1 = scmp.lt.u32.totalorder %s515_s13, %s951_s1 }
   0x9   :  { %p521_p2 = pnand %p519_p1, %p516_p0 }
   0xb   :  { %524 = shalt.err (!%p521_p2)
}
   0xc   :  { %s525_s18 = scalar_lea.vmem %s37_s10, 128  ;;  %p530_p4 = scmp.lt.s32.totalorder %s37_s10, %s37_s10 }
   0xd   :  { %p526_p3 = scmp.ne.s32.totalorder %s37_s10, %s525_s18  ;;  %p531_p5 = scmp.lt.s32.totalorder %s525_s18, %s525_s18 }
   0xf   :  { %p532_p6 = por %p531_p5, %p530_p4 }
  0x11   :  { %p533_p7 = pnand %p532_p6, %p526_p3 }
  0x13   :  { %536 = shalt.err (!%p533_p7)
}
  0x14   :  { %39 = dma.hbm_to_vmem [thread:$0]  %s951_s1, 128, %s37_s10, [#allocation6]  }
  0x15   :  { %s748_s21 = smov [#allocation8]   ;;  %s749_s23 = smov [#allocation11]  }
  0x16   :  { %s57_s22 = sshll.u32 %s748_s21, 4  ;;  %s79_s24 = sshll.u32 %s749_s23, 4  ;;  %s58_s22 = int_to_ptr.vmem [resolvable:$true] %s57_s22  ;;  %s80_s24 = int_to_ptr.vmem [resolvable:$true] %s79_s24 }
  0x17   :  { %s537_s27 = scalar_lea.hbm %s953_s3, 128 }
  0x18   :  { %p538_p8 = scmp.ne.s32.totalorder %s953_s3, %s537_s27  ;;  %p541_p9 = scmp.lt.u32.totalorder %s537_s27, %s953_s3 }
  0x1a   :  { %p543_p10 = pnand %p541_p9, %p538_p8 }
  0x1c   :  { %546 = shalt.err (!%p543_p10)
}
  0x1d   :  { %s547_s1 = scalar_lea.vmem %s58_s22, 128  ;;  %p552_p12 = scmp.lt.s32.totalorder %s58_s22, %s58_s22 }
  0x1e   :  { %p548_p11 = scmp.ne.s32.totalorder %s58_s22, %s547_s1  ;;  %p553_p13 = scmp.lt.s32.totalorder %s547_s1, %s547_s1 }
  0x20   :  { %p554_p0 = por %p553_p13, %p552_p12 }
  0x22   :  { %p555_p1 = pnand %p554_p0, %p548_p11 }
  0x24   :  { %558 = shalt.err (!%p555_p1)
}
  0x25   :  { %s750_s10 = smov 64   ;;  %s751_s12 = smov 4  }
  0x26   :  { %63 = dma.hbm_to_vmem [thread:$0]  %s953_s3, 128, %s58_s22, [#allocation9], %s750_s10, %s750_s10, %s751_s12  }
  0x27   :  { %s559_s17 = scalar_lea.hbm %s955_s5, 256 }
  0x28   :  { %p560_p2 = scmp.ne.s32.totalorder %s955_s5, %s559_s17  ;;  %p563_p3 = scmp.lt.u32.totalorder %s559_s17, %s955_s5 }
  0x2a   :  { %p565_p4 = pnand %p563_p3, %p560_p2 }
  0x2c   :  { %568 = shalt.err (!%p565_p4)
}
  0x2d   :  { %s569_s23 = scalar_lea.vmem %s80_s24, 256  ;;  %p574_p6 = scmp.lt.s32.totalorder %s80_s24, %s80_s24 }
  0x2e   :  { %p570_p5 = scmp.ne.s32.totalorder %s80_s24, %s569_s23  ;;  %p575_p7 = scmp.lt.s32.totalorder %s569_s23, %s569_s23 }
  0x30   :  { %p576_p8 = por %p575_p7, %p574_p6 }
  0x32   :  { %p577_p9 = pnand %p576_p8, %p570_p5 }
  0x34   :  { %580 = shalt.err (!%p577_p9)
}
  0x35   :  { %85 = dma.hbm_to_vmem [thread:$0]  %s955_s5, 256, %s80_s24, [#allocation12], %s750_s10, %s750_s10, %s751_s12  }
  0x36   :  { %s752_s25 = smov [#allocation14]   ;;  %s753_s27 = smov [#allocation2]  }
  0x37   :  { %s101_s26 = sshll.u32 %s752_s25, 4  ;;  %s26_s28 = sshll.u32 %s753_s27, 4  ;;  %s102_s26 = int_to_ptr.vmem [resolvable:$true] %s101_s26  ;;  %s27_s28 = int_to_ptr.vmem [resolvable:$true] %s26_s28 }
  0x38   :  { %s581_s11 = scalar_lea.hbm %s957_s7, 256 }
  0x39   :  { %p582_p10 = scmp.ne.s32.totalorder %s957_s7, %s581_s11  ;;  %p585_p11 = scmp.lt.u32.totalorder %s581_s11, %s957_s7 }
  0x3b   :  { %p587_p12 = pnand %p585_p11, %p582_p10 }
  0x3d   :  { %590 = shalt.err (!%p587_p12)
}
  0x3e   :  { %s591_s5 = scalar_lea.vmem %s102_s26, 256  ;;  %p596_p0 = scmp.lt.s32.totalorder %s102_s26, %s102_s26 }
  0x3f   :  { %p592_p13 = scmp.ne.s32.totalorder %s102_s26, %s591_s5  ;;  %p597_p1 = scmp.lt.s32.totalorder %s591_s5, %s591_s5 }
  0x41   :  { %p598_p2 = por %p597_p1, %p596_p0 }
  0x43   :  { %p599_p3 = pnand %p598_p2, %p592_p13 }
  0x45   :  { %602 = shalt.err (!%p599_p3)
}
  0x46   :  { %107 = dma.hbm_to_vmem [thread:$0]  %s957_s7, 256, %s102_s26, [#allocation15], %s750_s10, %s750_s10, %s751_s12  }
  0x47   :  { %s603_s19 = scalar_lea.hbm %s950_s0, 128 }
  0x48   :  { %p604_p4 = scmp.ne.s32.totalorder %s950_s0, %s603_s19  ;;  %p607_p5 = scmp.lt.u32.totalorder %s603_s19, %s950_s0 }
  0x4a   :  { %p609_p6 = pnand %p607_p5, %p604_p4 }
  0x4c   :  { %612 = shalt.err (!%p609_p6)
}
  0x4d   :  { %s613_s22 = scalar_lea.vmem %s27_s28, 128  ;;  %p618_p8 = scmp.lt.s32.totalorder %s27_s28, %s27_s28 }
  0x4e   :  { %p614_p7 = scmp.ne.s32.totalorder %s27_s28, %s613_s22  ;;  %p619_p9 = scmp.lt.s32.totalorder %s613_s22, %s613_s22 }
  0x50   :  { %p620_p10 = por %p619_p9, %p618_p8 }
  0x52   :  { %p621_p11 = pnand %p620_p10, %p614_p7 }
  0x54   :  { %624 = shalt.err (!%p621_p11)
}
  0x55   :  { %29 = dma.hbm_to_vmem [thread:$0]  %s950_s0, 128, %s27_s28, [#allocation3]  }
  0x56   :  { %s754_s26 = smov [#allocation7]   ;;  %s755_s29 = smov [#allocation10]  }
  0x57   :  { %s45_s27 = sshll.u32 %s754_s26, 4  ;;  %s70_s30 = sshll.u32 %s755_s29, 4  ;;  %s46_s27 = int_to_ptr.vmem [resolvable:$true] %s45_s27  ;;  %s71_s30 = int_to_ptr.vmem [resolvable:$true] %s70_s30 }
  0x58   :  { %s625_s13 = scalar_lea.hbm %s952_s2, 128 }
  0x59   :  { %p626_p12 = scmp.ne.s32.totalorder %s952_s2, %s625_s13  ;;  %p629_p13 = scmp.lt.u32.totalorder %s625_s13, %s952_s2 }
  0x5b   :  { %p631_p0 = pnand %p629_p13, %p626_p12 }
  0x5d   :  { %634 = shalt.err (!%p631_p0)
}
  0x5e   :  { %s635_s0 = scalar_lea.vmem %s46_s27, 128  ;;  %p640_p2 = scmp.lt.s32.totalorder %s46_s27, %s46_s27 }
  0x5f   :  { %p636_p1 = scmp.ne.s32.totalorder %s46_s27, %s635_s0  ;;  %p641_p3 = scmp.lt.s32.totalorder %s635_s0, %s635_s0 }
  0x61   :  { %p642_p4 = por %p641_p3, %p640_p2 }
  0x63   :  { %p643_p5 = pnand %p642_p4, %p636_p1 }
  0x65   :  { %646 = shalt.err (!%p643_p5)
}
  0x66   :  { %51 = dma.hbm_to_vmem [thread:$0]  %s952_s2, 128, %s46_s27, [#allocation6], %s750_s10, %s750_s10, %s751_s12  }
  0x67   :  { %s647_s19 = scalar_lea.hbm %s954_s4, 16 }
  0x68   :  { %p648_p6 = scmp.ne.s32.totalorder %s954_s4, %s647_s19  ;;  %p651_p7 = scmp.lt.u32.totalorder %s647_s19, %s954_s4 }
  0x6a   :  { %p653_p8 = pnand %p651_p7, %p648_p6 }
  0x6c   :  { %656 = shalt.err (!%p653_p8)
}
  0x6d   :  { %s657_s22 = scalar_lea.vmem %s71_s30, 16  ;;  %s661_s7 = scalar_lea.vmem %s71_s30, 32 }
  0x6e   :  { %p658_p9 = scmp.ne.s32.totalorder %s71_s30, %s657_s22  ;;  %p662_p10 = scmp.lt.s32.totalorder %s71_s30, %s71_s30 }
  0x6f   :  { %p663_p11 = scmp.lt.s32.totalorder %s661_s7, %s657_s22 }
  0x71   :  { %p664_p12 = por %p663_p11, %p662_p10 }
  0x73   :  { %p665_p13 = pnand %p664_p12, %p658_p9 }
  0x75   :  { %668 = shalt.err (!%p665_p13)
}
  0x76   :  { %73 = dma.hbm_to_vmem [thread:$0]  %s954_s4, 16, %s71_s30, [#allocation9]  }
  0x77   :  { %s756_s12 = smov [#allocation13]   ;;  %s757_s26 = smov [#allocation16]  }
  0x78   :  { %s92_s25 = sshll.u32 %s756_s12, 4  ;;  %s114_s27 = sshll.u32 %s757_s26, 4  ;;  %s93_s25 = int_to_ptr.vmem [resolvable:$true] %s92_s25  ;;  %s115_s27 = int_to_ptr.vmem [resolvable:$true] %s114_s27 }
  0x79   :  { %s669_s1 = scalar_lea.hbm %s956_s6, 16 }
  0x7a   :  { %p670_p0 = scmp.ne.s32.totalorder %s956_s6, %s669_s1  ;;  %p673_p1 = scmp.lt.u32.totalorder %s669_s1, %s956_s6 }
  0x7c   :  { %p675_p2 = pnand %p673_p1, %p670_p0 }
  0x7e   :  { %678 = shalt.err (!%p675_p2)
}
  0x7f   :  { %s679_s4 = scalar_lea.vmem %s93_s25, 16  ;;  %s683_s30 = scalar_lea.vmem %s93_s25, 32 }
  0x80   :  { %p680_p3 = scmp.ne.s32.totalorder %s93_s25, %s679_s4  ;;  %p684_p4 = scmp.lt.s32.totalorder %s93_s25, %s93_s25 }
  0x81   :  { %p685_p5 = scmp.lt.s32.totalorder %s683_s30, %s679_s4 }
  0x83   :  { %p686_p6 = por %p685_p5, %p684_p4 }
  0x85   :  { %p687_p7 = pnand %p686_p6, %p680_p3 }
  0x87   :  { %690 = shalt.err (!%p687_p7)
}
  0x88   :  { %95 = dma.hbm_to_vmem [thread:$0]  %s956_s6, 16, %s93_s25, [#allocation12]  }
  0x89   :  { %s691_s17 = scalar_lea.hbm %s958_s8, 16 }
  0x8a   :  { %p692_p8 = scmp.ne.s32.totalorder %s958_s8, %s691_s17  ;;  %p695_p9 = scmp.lt.u32.totalorder %s691_s17, %s958_s8 }
  0x8c   :  { %p697_p10 = pnand %p695_p9, %p692_p8 }
  0x8e   :  { %700 = shalt.err (!%p697_p10)
}
  0x8f   :  { %s701_s23 = scalar_lea.vmem %s115_s27, 16  ;;  %s705_s3 = scalar_lea.vmem %s115_s27, 32 }
  0x90   :  { %p702_p11 = scmp.ne.s32.totalorder %s115_s27, %s701_s23  ;;  %p706_p12 = scmp.lt.s32.totalorder %s115_s27, %s115_s27 }
  0x91   :  { %p707_p13 = scmp.lt.s32.totalorder %s705_s3, %s701_s23 }
  0x93   :  { %p708_p0 = por %p707_p13, %p706_p12 }
  0x95   :  { %p709_p1 = pnand %p708_p0, %p702_p11 }
  0x97   :  { %712 = shalt.err (!%p709_p1)
}
  0x98   :  { %117 = dma.hbm_to_vmem [thread:$0]  %s958_s8, 16, %s115_s27, [#allocation15]  }
  0x99   :  { %735 = dma.done.wait [#allocation3], 128  }
  0x9a   :  { %736 = vsyncadd [#allocation3], 4294967168 }
  0x9b   :  { %737 = dma.done.wait [#allocation6], 256  }
  0x9c   :  { %738 = vsyncadd [#allocation6], 4294967040 }
  0x9d   :  { %739 = dma.done.wait [#allocation9], 144  }
  0x9e   :  { %740 = vsyncadd [#allocation9], 4294967152 }
  0x9f   :  { %741 = dma.done.wait [#allocation12], 272  }
  0xa0   :  { %742 = vsyncadd [#allocation12], 4294967024 }
  0xa1   :  { %743 = dma.done.wait [#allocation15], 272  }
  0xa2   :  { %744 = vsyncadd [#allocation15], 4294967024  ;;  %v758_v0 = vmov 0.0   ;;  %vm759_vm0 = vmmov 0   ;;  %v503_v1 = vld [vmem:[#allocation8] sm:$0xff]   ;;  %v504_v2 = vld [vmem:[#allocation7] sm:$0xff]  }
  0xa3   :  { %461 = vmatprep.subr.bf16.mxu0 %v758_v0  ;;  %467 = vmatprep.subr.bf16.mxu1 %v758_v0  ;;  %v150_v3 = vld [vmem:[#allocation5] sm:$0xff]  ;;  %vm160_vm1 = vcmask 130048   ;;  %v146_v4 = vld [vmem:[#allocation2] sm:$0xff]  ;;  %v507_v9 = vld [vmem:[#allocation14] sm:$0xff]   ;;  %vm286_vm2 = vcmask 261120   ;;  %vm398_vm3 = vcmask 31744  }
  0xa4   :  { %463 = vmatprep.mubr.msk.bf16.mxu0 %vm759_vm0, %v758_v0  ;;  %469 = vmatprep.mubr.msk.bf16.mxu1 %vm759_vm0, %v758_v0  ;;  %v151_v5 = vpack.c.bf16 %v150_v3, %v150_v3  ;;  %v147_v6 = vpack.c.bf16 %v146_v4, %v146_v4  ;;  %v505_v7 = vld [vmem:[#allocation11] sm:$0xff]   ;;  %v506_v8 = vld [vmem:[#allocation11 + $0x8] sm:$0xff]   ;;  %v442_v12 = vld [vmem:[#allocation10] ss:$0 sm:$0xff]  ;;  %s760_s8 = smov [#allocation17]   ;;  %vm415_vm4 = vcmask 293888  }
  0xa5   :  { %462 = vmatpush3.bf16.msra.mxu0 %v503_v1  ;;  %468 = vmatpush3.bf16.msra.mxu1 %v504_v2  ;;  %v508_v23 = vld [vmem:[#allocation14 + $0x8] sm:$0xff]   ;;  %v443_v24 = vld [vmem:[#allocation13] ss:$0 sm:$0xff]  ;;  %v447_v32 = vld [vmem:[#allocation16] ss:$0 sm:$0xff]  ;;  %s425_s7 = sshll.u32 %s760_s8, 4  ;;  %s426_s7 = int_to_ptr.vmem [resolvable:$true] %s425_s7 }
  0xa6   :  { %473 = vmatprep.subr.bf16.mxu0 %v758_v0  ;;  %481 = vmatprep.subr.bf16.mxu1 %v758_v0  ;;  %vm417_vm5 = vcmask 326656   ;;  %s713_s2 = scalar_lea.vmem %s426_s7, 128  ;;  %p718_p3 = scmp.lt.s32.totalorder %s426_s7, %s426_s7 }
  0xa7   :  { %p714_p2 = scmp.ne.s32.totalorder %s426_s7, %s713_s2  ;;  %p719_p4 = scmp.lt.s32.totalorder %s713_s2, %s713_s2 }
  0xa8   :  { %464 = vmatmul.mubr.msk.bf16.vlgmr.msra.gmra.mrb[0].mxu0 %vm160_vm1, %v151_v5  ;;  %470 = vmatmul.mubr.msk.bf16.vlgmr.msra.gmra.mrb[0].mxu1 %vm160_vm1, %v147_v6 }
  0xa9   :  { %477 = vmatprep.mubr.msk.bf16.mxu0 %vm759_vm0, %v758_v0  ;;  %485 = vmatprep.mubr.msk.bf16.mxu1 %vm759_vm0, %v758_v0  ;;  %p720_p5 = por %p719_p4, %p718_p3 }
  0xaa   :  { %474 = vmatpush3.bf16.msra.mxu0 %v505_v7  ;;  %482 = vmatpush3.bf16.msra.mxu1 %v507_v9 }
  0xab   :  { %475 = vmatprep.subr.bf16.mxu0 %v758_v0  ;;  %483 = vmatprep.subr.bf16.mxu1 %v758_v0  ;;  %p721_p6 = pnand %p720_p5, %p714_p2 }
  0xae   :  { %476 = vmatpush3.bf16.msra.mxu0 %v506_v8  ;;  %484 = vmatpush3.bf16.msra.mxu1 %v508_v23 }
 0x17b   :  { %v198_v10 = vpop.f32.mrb[0].mxu0  ;;  %v247_v11 = vpop.f32.mrb[0].mxu1 }
 0x17c   :  { %v465_v13 = vpop.f32.mrb[1].mxu0  ;;  %v248_v14 = vadd.f32 %v247_v11, %v198_v10  ;;  %v471_v15 = vpop.f32.mrb[1].mxu1 }
 0x17d   :  { %v201_v16 = vpop.f32.mrb[2].mxu0  ;;  %v250_v17 = vpop.f32.mrb[2].mxu1 }
 0x17e   :  { %v466_v18 = vpop.f32.mrb[3].mxu0  ;;  %v260_v19 = vadd.f32 %v442_v12, %v248_v14  ;;  %v472_v20 = vpop.f32.mrb[3].mxu1 }
 0x180   :  { %v261_v21 = vmax.f32 %v260_v19, 0.0 }
 0x182   :  { %v262_v22 = vpack.c.bf16 %v261_v21, %v261_v21 }
 0x184   :  { %478 = vmatmul.mubr.msk.bf16.vlgmr.msra.gmra.mrb[4].mxu0 %vm286_vm2, %v262_v22 }
 0x257   :  { %v324_v25 = vpop.f32.mrb[4].mxu0 }
 0x258   :  { %v325_v26 = vadd.f32 %v443_v24, %v324_v25  ;;  %v479_v27 = vpop.f32.mrb[5].mxu0 }
 0x259   :  { %v327_v28 = vpop.f32.mrb[6].mxu0 }
 0x25a   :  { %v330_v29 = vmax.f32 %v325_v26, 0.0  ;;  %v480_v30 = vpop.f32.mrb[7].mxu0 }
 0x25c   :  { %v331_v31 = vpack.c.bf16 %v330_v29, %v330_v29 }
 0x25e   :  { %486 = vmatmul.mubr.msk.bf16.vlgmr.msra.gmra.mrb[4].mxu1 %vm286_vm2, %v331_v31 }
 0x331   :  { %v392_v33 = vpop.f32.mrb[4].mxu1 }
 0x332   :  { %v393_v34 = vadd.f32 %v447_v32, %v392_v33  ;;  %v487_v35 = vpop.f32.mrb[5].mxu1 }
 0x333   :  { %v395_v36 = vpop.f32.mrb[6].mxu1 }
 0x334   :  { %v488_v37 = vpop.f32.mrb[7].mxu1  ;;  %v399_v38 = vsel %vm398_vm3, %v393_v34, -inf  ;;  %v411_v44 = vadd.f32 1e-06, %v393_v34 }
 0x335   :  { %400 = vmax.xlane.f32.xlu0 %v399_v38 }
 0x336   :  { %v412_v46 = vmul.f32 1.442695, %v411_v44 }
 0x3c2   :  { %v401_v39 = vpop.xlane.xlu0 %400 }
 0x3c3   :  { %v402_v40 = vsub.f32 %v393_v34, %v401_v39 }
 0x3c5   :  { %v403_v41 = vmul.f32 1.442695, %v402_v40 }
 0x3c7   :  { %509 = vpow2.f32 %v403_v41 }
 0x3d1   :  { %v510_v42 = vpop.eup %509 }
 0x3d2   :  { %v405_v43 = vsel %vm398_vm3, %v510_v42, 0.0 }
 0x3d3   :  { %406 = vadd.xlane.f32.xlu0 %v405_v43 }
 0x460   :  { %v407_v45 = vpop.xlane.xlu0 %406 }
 0x461   :  { %511 = vlog2.f32 %v407_v45 }
 0x462   :  { %513 = vpow2.f32 %v412_v46 }
 0x46b   :  { %v512_v47 = vpop.eup %511 }
 0x46c   :  { %v409_v48 = vmul.f32 0.6931472, %v512_v47  ;;  %v514_v50 = vpop.eup %513 }
 0x46e   :  { %v410_v49 = vsub.f32 %v402_v40, %v409_v48 }
 0x470   :  { %v414_v51 = vsel %vm398_vm3, %v410_v49, %v393_v34 }
 0x471   :  { %v416_v52 = vsel %vm415_vm4, %v414_v51, %v514_v50 }
 0x472   :  { %418 = vst.msk [vmem:[#allocation17] sm:$0xff] %vm417_vm5, %v416_v52 }
 0x473   :  { %724 = shalt.err (!%p721_p6)
}
 0x474   :  { %s725_s25 = scalar_lea.hbm %s959_s9, 128 }
 0x475   :  { %p726_p7 = scmp.ne.s32.totalorder %s959_s9, %s725_s25  ;;  %p729_p8 = scmp.lt.u32.totalorder %s725_s25, %s959_s9 }
 0x477   :  { %p731_p9 = pnand %p729_p8, %p726_p7 }
 0x479   :  { %734 = shalt.err (!%p731_p9)
}
 0x47a   :  { %428 = dma.vmem_to_hbm [thread:$0]  %s426_s7, 128, %s959_s9, [#allocation4]  }
 0x47b   :  { %745 = dma.done.wait [#allocation4], 128  }
 0x47c   :  { %746 = vsyncadd [#allocation4], 4294967168 }
 0x47d   :  { %432 = vsyncpa [#allocation3], 1 }
 0x47e   :  { %433 = vsyncpa [#allocation6], 1 }
 0x47f   :  { %434 = vsyncpa [#allocation9], 1 }
 0x480   :  { %435 = vsyncpa [#allocation12], 1 }
 0x481   :  { %436 = vsyncpa [#allocation15], 1 }
 0x482   :  { %437 = vsyncpa [#allocation4], 1 }

</bundles_post_ra>
